<compile_context>
chip_gen: v5e
topology: v5e:2x2
jax: 0.10.0
libtpu: 0.0.40
codegen_flags: <defaults>
</compile_context>

<pallas_src>
import math
import functools

import jax
import jax.numpy as jnp
from jax.experimental import pallas as pl
from jax.experimental.pallas import tpu as pltpu


def _attention_kernel(x_ref, mask_ref, w_ref, b_ref, out_ref, *, num_heads, d_h):
    """One batch element per grid step.  All activations are token-minor:
         x_ref    : (1, 3, E, S)  bf16  [q_^T, k_^T, v_^T] for this batch
         mask_ref : (1, 1, S)     int32 query-row keep mask
         w_ref    : (4, E, E)     bf16  [Wq^T, Wk^T, Wv^T, Wf^T]
         b_ref    : (4, E, 1)     f32   [bq, bk, bv, bf] as columns
         out_ref  : (1, E, S)     f32   fc(concat_heads(attn) + q_), transposed
    """
    H, D = num_heads, d_h
    E = H * D
    S = x_ref.shape[-1]

    x = x_ref[0]                                   # (3, E, S) bf16
    w = w_ref[...]                                 # (4, E, E) bf16
    b = b_ref[...]                                 # (4, E, 1) f32

    # ---- fused Q/K/V projection: one full-width, E-deep matmul per source ----
    yT = jnp.einsum("nfe,nes->nfs", w[:3], x,
                    preferred_element_type=jnp.float32) + b[:3]   # (3, E, S) f32

    # ---- head split: E sublanes -> (H, d_h); tile-aligned, no data movement --
    qT = yT[0].reshape(H, D, S)                    # (H, D, S)
    kT = yT[1].reshape(H, D, S)
    vT = yT[2].reshape(H, D, S)

    # ---- scores kept transposed:  sT[h, k, q] = (q_h . k_h) / sqrt(d_h) ------
    kh = jnp.swapaxes(kT, 1, 2).astype(jnp.bfloat16)               # (H, S, D)
    sT = jnp.einsum("hkd,hdq->hkq", kh, qT.astype(jnp.bfloat16),
                    preferred_element_type=jnp.float32)
    sT = sT * (1.0 / math.sqrt(D))                                 # (H, Sk, Sq)

    # query-row masking (masked_fill_ semantics); query rows live on lanes here
    keep = jnp.broadcast_to(mask_ref[...], sT.shape) != 0
    sT = jnp.where(keep, sT, jnp.float32(-1e12))

    # numerically-stable softmax over keys (sublane axis), kept in f32;
    # the reciprocal goes to the EUP slot.
    sT = sT - jnp.max(sT, axis=1, keepdims=True)
    pT = jnp.exp(sT)
    pT = pT * pl.reciprocal(jnp.sum(pT, axis=1, keepdims=True), approx=True)
    # TODO(synk): dropout on the attention probabilities is identity (eval / drop=0).

    # ---- PV:  oT[h, d, q] = sum_k v[h, k, d] * p[h, q, k] --------------------
    oT = jnp.einsum("hdk,hkq->hdq", vT.astype(jnp.bfloat16),
                    pT.astype(jnp.bfloat16),
                    preferred_element_type=jnp.float32)            # (H, D, S)

    # ---- fc(concat_heads + q_): heads re-merge for free along sublanes and the
    #      residual is folded in BEFORE a single full-depth (E x E) matmul -----
    fc_in = (oT.reshape(E, S) + x[0].astype(jnp.float32)).astype(jnp.bfloat16)
    outT = jnp.dot(w[3], fc_in, preferred_element_type=jnp.float32) + b[3]
    out_ref[...] = outT[None].astype(out_ref.dtype)


def attention_forward(q_, k_, v_, mask, params, num_heads):
    B, S, E = q_.shape
    assert E % num_heads == 0, "emb_dim must be divisible by num_heads"
    d_h = E // num_heads
    wq, bq, wk, bk, wv, bv, wf, bf = params

    # Pack all operands (was 13, now 4): token-minor activation slab, int32
    # mask, bf16 transposed weight slab, f32 bias slab (columns).
    xT = jnp.stack([q_, k_, v_], axis=1).swapaxes(-1, -2).astype(jnp.bfloat16)  # (B,3,E,S)
    w4 = jnp.stack([wq.T, wk.T, wv.T, wf.T], axis=0).astype(jnp.bfloat16)       # (4,E,E)
    b4 = jnp.stack([bq, bk, bv, bf], axis=0).astype(jnp.float32)[:, :, None]    # (4,E,1)
    mask_i = mask.astype(jnp.int32)[:, None, :]                                 # (B,1,S)

    kernel = functools.partial(_attention_kernel, num_heads=num_heads, d_h=d_h)

    # TODO(synk): at production seq lengths add q-/kv-tile grid axes with an
    # online-softmax accumulator (flash pattern) and single-buffered
    # (pl.Buffered(1)) weight specs so the (H,S,S) scores never have to be
    # resident at once (v7x has only 64 MiB VMEM per TensorCore).
    outT = pl.pallas_call(
        kernel,
        out_shape=jax.ShapeDtypeStruct((B, E, S), q_.dtype),
        grid_spec=pltpu.PrefetchScalarGridSpec(
            num_scalar_prefetch=0,
            grid=(B,),
            in_specs=[
                pl.BlockSpec((1, 3, E, S), lambda b: (b, 0, 0, 0)),
                pl.BlockSpec((1, 1, S), lambda b: (b, 0, 0)),
                pl.BlockSpec((4, E, E), lambda b: (0, 0, 0)),
                pl.BlockSpec((4, E, 1), lambda b: (0, 0, 0)),
            ],
            out_specs=pl.BlockSpec((1, E, S), lambda b: (b, 0, 0)),
        ),
        compiler_params=pltpu.CompilerParams(
            dimension_semantics=("parallel",),
            vmem_limit_bytes=64 * 1024 * 1024),
    )(xT, mask_i, w4, b4)
    # kernel output is token-minor; restore (B, S, E) in the wrapper.
    return outT.swapaxes(-1, -2)


def attention_ref(q_, k_, v_, mask, params, num_heads):
    """Pure-JAX reference reproducing the PyTorch forward."""
    B, S, E = q_.shape
    d_h = E // num_heads
    wq, bq, wk, bk, wv, bv, wf, bf = params
    q = q_ @ wq + bq
    k = k_ @ wk + bk
    v = v_ @ wv + bv
    q = q.reshape(B, S, num_heads, d_h).transpose(0, 2, 1, 3)
    k = k.reshape(B, S, num_heads, d_h).transpose(0, 2, 1, 3)
    v = v.reshape(B, S, num_heads, d_h).transpose(0, 2, 1, 3)
    attn = jnp.einsum("bhqd,bhkd->bhqk", q, k) / math.sqrt(d_h)
    m = mask[:, None, :, None]                      # (B,1,Sq,1) query-row mask
    attn = jnp.where(m, attn, jnp.float32(-1e12))
    p = jax.nn.softmax(attn, axis=-1)
    out = jnp.einsum("bhqk,bhkd->bqhd", p, v).reshape(B, S, E)
    return (out + q_) @ wf + bf


if __name__ == "__main__":
    B, S, E, H = 2, 8, 32, 4        # batch, seq, emb_dim, num_heads (drop = 0.0)

    key = jax.random.PRNGKey(0)
    keys = jax.random.split(key, 12)

    def lin_params(kw, kb, fan_in, fan_out):
        w = jax.random.normal(kw, (fan_in, fan_out), jnp.float32) * 0.02
        b = jax.random.normal(kb, (fan_out,), jnp.float32) * 0.02
        return w, b

    wq, bq = lin_params(keys[0], keys[1], E, E)
    wk, bk = lin_params(keys[2], keys[3], E, E)
    wv, bv = lin_params(keys[4], keys[5], E, E)
    wf, bf = lin_params(keys[6], keys[7], E, E)
    params = (wq, bq, wk, bk, wv, bv, wf, bf)

    q_ = jax.random.normal(keys[8], (B, S, E), jnp.float32)
    k_ = jax.random.normal(keys[9], (B, S, E), jnp.float32)
    v_ = jax.random.normal(keys[10], (B, S, E), jnp.float32)
    mask = jax.random.bernoulli(keys[11], 0.7, (B, S))        # bool (B, S)

    out = attention_forward(q_, k_, v_, mask, params, H)
    out = jax.block_until_ready(out)

    ref = attention_ref(q_, k_, v_, mask, params, H)
    assert out.shape == (B, S, E)
    err = jnp.max(jnp.abs(out - ref))
    # bf16 matmul operands in the kernel (default-precision MXU is bf16 anyway)
    # -> compare at bf16-level tolerance.
    assert jnp.allclose(out, ref, atol=1e-2, rtol=1e-2), f"max abs err = {err}"

    print("KERNEL_OK")
</pallas_src>

<mosaic_0001>
module attributes {stable_mosaic.version = 11 : i64} {
  func.func @_attention_kernel(%arg0: i32, %arg1: memref<1x3x32x8xbf16, #tpu.memory_space<vmem>>, %arg2: memref<1x1x8xi32, #tpu.memory_space<vmem>>, %arg3: memref<4x32x32xbf16, #tpu.memory_space<vmem>>, %arg4: memref<4x32x1xf32, #tpu.memory_space<vmem>>, %arg5: memref<1x32x8xf32, #tpu.memory_space<vmem>>) attributes {dimension_semantics = [#tpu.dimension_semantics<parallel>], iteration_bounds = array<i64: 2>, scalar_prefetch = 0 : i64, scratch_operands = 0 : i64, tpu.core_type = #tpu.core_type<tc>, window_params = [{transform_indices = @transform_0, window_bounds = array<i64: 1, 3, 32, 8>}, {transform_indices = @transform_1, window_bounds = array<i64: 1, 1, 8>}, {pipeline_mode = #tpu.pipeline_mode<synchronous>, transform_indices = @transform_2, window_bounds = array<i64: 4, 32, 32>}, {pipeline_mode = #tpu.pipeline_mode<synchronous>, transform_indices = @transform_3, window_bounds = array<i64: 4, 32, 1>}, {transform_indices = @transform_4, window_bounds = array<i64: 1, 32, 8>}]} {
    %c0 = arith.constant 0 : index
    %c0_0 = arith.constant 0 : index
    %c0_1 = arith.constant 0 : index
    %c0_2 = arith.constant 0 : index
    %0 = vector.load %arg1[%c0, %c0_0, %c0_1, %c0_2] : memref<1x3x32x8xbf16, #tpu.memory_space<vmem>>, vector<1x3x32x8xbf16>
    %1 = vector.shape_cast %0 : vector<1x3x32x8xbf16> to vector<3x32x8xbf16>
    %c0_3 = arith.constant 0 : index
    %c0_4 = arith.constant 0 : index
    %c0_5 = arith.constant 0 : index
    %2 = vector.load %arg3[%c0_3, %c0_4, %c0_5] : memref<4x32x32xbf16, #tpu.memory_space<vmem>>, vector<4x32x32xbf16>
    %c0_6 = arith.constant 0 : index
    %c0_7 = arith.constant 0 : index
    %c0_8 = arith.constant 0 : index
    %3 = vector.load %arg4[%c0_6, %c0_7, %c0_8] : memref<4x32x1xf32, #tpu.memory_space<vmem>>, vector<4x32x1xf32>
    %4 = vector.extract_strided_slice %2 {offsets = [0, 0, 0], sizes = [3, 32, 32], strides = [1, 1, 1]} : vector<4x32x32xbf16> to vector<3x32x32xbf16>
    "tpu.trace_start"() <{level = 10 : i32, message = "nfe,nes->nfs"}> : () -> ()
    %cst = arith.constant dense<0.000000e+00> : vector<3x32x8xf32>
    %5 = tpu.matmul %4, %1, %cst {dimension_numbers = #tpu.dot_dimension_numbers<[2], [1], [1], [2], [0, 0, 0, 1, 1, 2], [0], [0]>} : vector<3x32x32xbf16>, vector<3x32x8xbf16>, vector<3x32x8xf32> -> vector<3x32x8xf32>
    "tpu.trace_stop"() : () -> ()
    %6 = vector.extract_strided_slice %3 {offsets = [0, 0, 0], sizes = [3, 32, 1], strides = [1, 1, 1]} : vector<4x32x1xf32> to vector<3x32x1xf32>
    %7 = vector.broadcast %6 : vector<3x32x1xf32> to vector<3x32x8xf32>
    %8 = arith.addf %5, %7 : vector<3x32x8xf32>
    %9 = vector.extract_strided_slice %8 {offsets = [0, 0, 0], sizes = [1, 32, 8], strides = [1, 1, 1]} : vector<3x32x8xf32> to vector<1x32x8xf32>
    %10 = vector.shape_cast %9 : vector<1x32x8xf32> to vector<32x8xf32>
    %11 = vector.shape_cast %10 : vector<32x8xf32> to vector<4x8x8xf32>
    %12 = vector.extract_strided_slice %8 {offsets = [1, 0, 0], sizes = [1, 32, 8], strides = [1, 1, 1]} : vector<3x32x8xf32> to vector<1x32x8xf32>
    %13 = vector.shape_cast %12 : vector<1x32x8xf32> to vector<32x8xf32>
    %14 = vector.shape_cast %13 : vector<32x8xf32> to vector<4x8x8xf32>
    %15 = vector.extract_strided_slice %8 {offsets = [2, 0, 0], sizes = [1, 32, 8], strides = [1, 1, 1]} : vector<3x32x8xf32> to vector<1x32x8xf32>
    %16 = vector.shape_cast %15 : vector<1x32x8xf32> to vector<32x8xf32>
    %17 = vector.shape_cast %16 : vector<32x8xf32> to vector<4x8x8xf32>
    %18 = tpu.transpose %14, [0, 2, 1] : vector<4x8x8xf32> -> vector<4x8x8xf32>
    %19 = arith.truncf %18 : vector<4x8x8xf32> to vector<4x8x8xbf16>
    %20 = arith.truncf %11 : vector<4x8x8xf32> to vector<4x8x8xbf16>
    "tpu.trace_start"() <{level = 10 : i32, message = "hkd,hdq->hkq"}> : () -> ()
    %cst_9 = arith.constant dense<0.000000e+00> : vector<4x8x8xf32>
    %21 = tpu.matmul %19, %20, %cst_9 {dimension_numbers = #tpu.dot_dimension_numbers<[2], [1], [1], [2], [0, 0, 0, 1, 1, 2], [0], [0]>} : vector<4x8x8xbf16>, vector<4x8x8xbf16>, vector<4x8x8xf32> -> vector<4x8x8xf32>
    "tpu.trace_stop"() : () -> ()
    %cst_10 = arith.constant 0.353553385 : f32
    %22 = vector.broadcast %cst_10 : f32 to vector<4x8x8xf32>
    %23 = arith.mulf %21, %22 : vector<4x8x8xf32>
    %c0_11 = arith.constant 0 : index
    %c0_12 = arith.constant 0 : index
    %c0_13 = arith.constant 0 : index
    %24 = vector.load %arg2[%c0_11, %c0_12, %c0_13] : memref<1x1x8xi32, #tpu.memory_space<vmem>>, vector<1x1x8xi32>
    %25 = vector.shape_cast %24 : vector<1x1x8xi32> to vector<1x1x8xi32>
    %26 = vector.broadcast %25 : vector<1x1x8xi32> to vector<4x8x8xi32>
    %c0_i32 = arith.constant 0 : i32
    %27 = vector.broadcast %c0_i32 : i32 to vector<4x8x8xi32>
    %28 = arith.cmpi ne, %26, %27 : vector<4x8x8xi32>
    %cst_14 = arith.constant -9.99999995E+11 : f32
    %29 = vector.broadcast %cst_14 : f32 to vector<4x8x8xf32>
    %30 = arith.select %28, %23, %29 : vector<4x8x8xi1>, vector<4x8x8xf32>
    %cst_15 = arith.constant dense<0xFF800000> : vector<4x8xf32>
    %31 = vector.multi_reduction <maximumf>, %30, %cst_15 [1] : vector<4x8x8xf32> to vector<4x8xf32>
    %32 = vector.shape_cast %31 : vector<4x8xf32> to vector<4x1x8xf32>
    %33 = vector.broadcast %32 : vector<4x1x8xf32> to vector<4x8x8xf32>
    %34 = arith.subf %30, %33 : vector<4x8x8xf32>
    %35 = math.exp %34 : vector<4x8x8xf32>
    %cst_16 = arith.constant dense<0.000000e+00> : vector<4x8xf32>
    %36 = vector.multi_reduction <add>, %35, %cst_16 [1] : vector<4x8x8xf32> to vector<4x8xf32>
    %37 = vector.shape_cast %36 : vector<4x8xf32> to vector<4x1x8xf32>
    %38 = tpu.reciprocal %37 {approx = true} : vector<4x1x8xf32> -> vector<4x1x8xf32>
    %39 = vector.broadcast %38 : vector<4x1x8xf32> to vector<4x8x8xf32>
    %40 = arith.mulf %35, %39 : vector<4x8x8xf32>
    %41 = arith.truncf %17 : vector<4x8x8xf32> to vector<4x8x8xbf16>
    %42 = arith.truncf %40 : vector<4x8x8xf32> to vector<4x8x8xbf16>
    "tpu.trace_start"() <{level = 10 : i32, message = "hdk,hkq->hdq"}> : () -> ()
    %cst_17 = arith.constant dense<0.000000e+00> : vector<4x8x8xf32>
    %43 = tpu.matmul %41, %42, %cst_17 {dimension_numbers = #tpu.dot_dimension_numbers<[2], [1], [1], [2], [0, 0, 0, 1, 1, 2], [0], [0]>} : vector<4x8x8xbf16>, vector<4x8x8xbf16>, vector<4x8x8xf32> -> vector<4x8x8xf32>
    "tpu.trace_stop"() : () -> ()
    %44 = vector.shape_cast %43 : vector<4x8x8xf32> to vector<32x8xf32>
    %45 = vector.extract_strided_slice %1 {offsets = [0, 0, 0], sizes = [1, 32, 8], strides = [1, 1, 1]} : vector<3x32x8xbf16> to vector<1x32x8xbf16>
    %46 = vector.shape_cast %45 : vector<1x32x8xbf16> to vector<32x8xbf16>
    %47 = arith.extf %46 : vector<32x8xbf16> to vector<32x8xf32>
    %48 = arith.addf %44, %47 : vector<32x8xf32>
    %49 = arith.truncf %48 : vector<32x8xf32> to vector<32x8xbf16>
    %50 = vector.extract_strided_slice %2 {offsets = [3, 0, 0], sizes = [1, 32, 32], strides = [1, 1, 1]} : vector<4x32x32xbf16> to vector<1x32x32xbf16>
    %51 = vector.shape_cast %50 : vector<1x32x32xbf16> to vector<32x32xbf16>
    %cst_18 = arith.constant dense<0.000000e+00> : vector<32x8xf32>
    %52 = tpu.matmul %51, %49, %cst_18 {dimension_numbers = #tpu.dot_dimension_numbers<[1], [0], [0], [1], [0, 0, 1, 1], [], []>} : vector<32x32xbf16>, vector<32x8xbf16>, vector<32x8xf32> -> vector<32x8xf32>
    %53 = vector.extract_strided_slice %3 {offsets = [3, 0, 0], sizes = [1, 32, 1], strides = [1, 1, 1]} : vector<4x32x1xf32> to vector<1x32x1xf32>
    %54 = vector.shape_cast %53 : vector<1x32x1xf32> to vector<32x1xf32>
    %55 = vector.broadcast %54 : vector<32x1xf32> to vector<32x8xf32>
    %56 = arith.addf %52, %55 : vector<32x8xf32>
    %57 = vector.shape_cast %56 : vector<32x8xf32> to vector<1x32x8xf32>
    %c0_19 = arith.constant 0 : index
    %c0_20 = arith.constant 0 : index
    %c0_21 = arith.constant 0 : index
    %58 = vector.load %arg5[%c0_19, %c0_20, %c0_21] : memref<1x32x8xf32, #tpu.memory_space<vmem>>, vector<1x32x8xf32>
    tpu.vector_store %arg5[%c0_19, %c0_20, %c0_21], %57 {strides = array<i32>} : memref<1x32x8xf32, #tpu.memory_space<vmem>>, vector<1x32x8xf32>,
    return
  }
  func.func @transform_0(%arg0: i32) -> (i32, i32, i32, i32) {
    %c0_i32 = arith.constant 0 : i32
    %c0_i32_0 = arith.constant 0 : i32
    %c0_i32_1 = arith.constant 0 : i32
    %c0_i32_2 = arith.constant 0 : i32
    return %arg0, %c0_i32, %c0_i32_0, %c0_i32_1 : i32, i32, i32, i32
  }
  func.func @transform_1(%arg0: i32) -> (i32, i32, i32) {
    %c0_i32 = arith.constant 0 : i32
    %c0_i32_0 = arith.constant 0 : i32
    %c0_i32_1 = arith.constant 0 : i32
    return %arg0, %c0_i32, %c0_i32_0 : i32, i32, i32
  }
  func.func @transform_2(%arg0: i32) -> (i32, i32, i32) {
    %c0_i32 = arith.constant 0 : i32
    %c0_i32_0 = arith.constant 0 : i32
    %c0_i32_1 = arith.constant 0 : i32
    %c0_i32_2 = arith.constant 0 : i32
    return %c0_i32, %c0_i32_0, %c0_i32_1 : i32, i32, i32
  }
  func.func @transform_3(%arg0: i32) -> (i32, i32, i32) {
    %c0_i32 = arith.constant 0 : i32
    %c0_i32_0 = arith.constant 0 : i32
    %c0_i32_1 = arith.constant 0 : i32
    %c0_i32_2 = arith.constant 0 : i32
    return %c0_i32, %c0_i32_0, %c0_i32_1 : i32, i32, i32
  }
  func.func @transform_4(%arg0: i32) -> (i32, i32, i32) {
    %c0_i32 = arith.constant 0 : i32
    %c0_i32_0 = arith.constant 0 : i32
    %c0_i32_1 = arith.constant 0 : i32
    return %arg0, %c0_i32, %c0_i32_0 : i32, i32, i32
  }
}

</mosaic_0001>

<bundles_post_ra>
// kernel: tpu_custom_call.1
= control target key start
LH: loop header
LB: loop body
LE: loop exit
PB: predicated region body
PF: predicated region fallthrough
CT: control target
= control target key end

     0   :  { %s1141_s15 = smov 0   ;;  %s1294_s0 = inlined_call_operand.vmem [shape: bf16[2,3,32,8], index: 0, kind: input, shape index: {}]   ;;  %s1295_s1 = inlined_call_operand.vmem [shape: s32[2,1,8], index: 1, kind: input, shape index: {}]   ;;  %s1296_s2 = inlined_call_operand.vmem [shape: bf16[4,32,32], index: 2, kind: input, shape index: {}]   ;;  %s1297_s3 = inlined_call_operand.vmem [shape: f32[4,32,1], index: 3, kind: input, shape index: {}]   ;;  %s1298_s4 = inlined_call_operand.vmem [shape: f32[2,32,8], index: 4, kind: output, shape index: {}]  }
   0x1 LB: > { %s977_s16 = sadd.s32 4294967295, %s1113_s15   ;;  %p981_p0 = scmp.ge.s32.totalorder %s1113_s15, 1  ;;  %s1113_s15 = sphi %s1141_s15, %s14_s15  }
   0x2   : > { %p170_p1 = scmp.lt.s32.totalorder %s1113_s15, 3 }
   0x4   : > { %p171_p2 = pnand %p981_p0, %p170_p1 }
   0x5   : > { %p199_p3 = scmp.lt.s32.totalorder (!%p171_p2), %s977_s16, 1 }
   0x6   : > { %174 = sbr.rel (%p171_p2) target bundleno = 826 (0x33a), region = 36 }
   0xb   : > { %v245_v0 = vld [vmem:[%s1297_s3 + $0x20] sm:$0xff]  ;;  %v1115_v1 = vmov 0   ;;  %v246_v2 = vld [vmem:[%s1297_s3 + $0x28] sm:$0xff]  ;;  %s1300_s16 = smov (!%p199_p3, %s977_s16), 1  ;;  %v247_v3 = vld [vmem:[%s1297_s3 + $0x30] sm:$0xff]  ;;  %vm339_vm0 = vcmask 261120  }
   0xc   : > { %1087 = vset.pattern.permute.xlu0 %v1115_v1  ;;  %1088 = vset.pattern.permute.xlu1 %v1115_v1  ;;  %s1076_s23 = smul.u32 48, %s1300_s16  ;;  %v241_v6 = vld [vmem:[%s1297_s3] sm:$0xff]  ;;  %v242_v7 = vld [vmem:[%s1297_s3 + $0x8] sm:$0xff]  ;;  %v1068_v11 = vld [vmem:[%s1296_s2 + $0x10] sm:$0xff]  ;;  %vm599_vm1 = vcmask 1043456   ;;  %s206_s6 = scalar_lea.vmem %s1295_s1, %s1300_s16  ;;  %vm595_vm2 = vcmask 64512  }
   0xd   : > { %279 = vperm.xlu0 %1087, %v245_v0   ;;  %284 = vperm.xlu1 %1088, %v246_v2   ;;  %v1066_v10 = vld [vmem:[%s1296_s2] sm:$0xff]  ;;  %v1069_v12 = vld [vmem:[%s1296_s2 + $0x18] sm:$0xff]  ;;  %v243_v13 = vld [vmem:[%s1297_s3 + $0x10] sm:$0xff]  ;;  %s1059_s24 = sshll.u32 %s1300_s16, 5 }
   0xe   : > { %1089 = vset.pattern.permute.xlu2 %v1115_v1  ;;  %s1164_s26 = scalar_lea.vmem %s1294_s0, %s1076_s23  ;;  %v248_v14 = vld [vmem:[%s1297_s3 + $0x38] sm:$0xff]  ;;  %v1067_v16 = vld [vmem:[%s1296_s2 + $0x8] sm:$0xff]  ;;  %v1070_v27 = vld [vmem:[%s1296_s2 + $0x20] sm:$0xff]  ;;  %s211_s28 = scalar_lea.vmem %s1298_s4, %s1059_s24 }
   0xf   : > { %289 = vperm.xlu2 %1089, %v247_v3   ;;  %v1061_v4 = vld [vmem:[%s1164_s26 + $0x8] sm:$0xff]  ;;  %v1063_v5 = vld [vmem:[%s1164_s26 + $0x18] sm:$0xff]  ;;  %v1060_v8 = vld [vmem:[%s1164_s26] sm:$0xff] }
  0x10   : > { %352 = vmatpush.bf16.msra.mxu0 %v1061_v4  ;;  %399 = vmatpush.bf16.msra.mxu1 %v1063_v5  ;;  %v1062_v9 = vld [vmem:[%s1164_s26 + $0x10] sm:$0xff]  ;;  %v244_v15 = vld [vmem:[%s1297_s3 + $0x18] sm:$0xff]  ;;  %v1065_v19 = vld [vmem:[%s1164_s26 + $0x28] sm:$0xff] }
  0x11   : > { %1074 = vmatpush.bf16.msra.mxu2 %v1063_v5  ;;  %v1064_v23 = vld [vmem:[%s1164_s26 + $0x20] sm:$0xff]  ;;  %v1071_v45 = vld [vmem:[%s1296_s2 + $0x28] sm:$0xff]  ;;  %v252_v51 = vld [vmem:[%s1297_s3 + $0x58] sm:$0xff] }
  0x12   : > { %v253_v52 = vld [vmem:[%s1297_s3 + $0x60] sm:$0xff]  ;;  %v255_v53 = vld [vmem:[%s1297_s3 + $0x70] sm:$0xff]  ;;  %v250_v54 = vld [vmem:[%s1297_s3 + $0x48] sm:$0xff] }
  0x13   : > { %v251_v55 = vld [vmem:[%s1297_s3 + $0x50] sm:$0xff]  ;;  %v249_v56 = vld [vmem:[%s1297_s3 + $0x40] sm:$0xff]  ;;  %v254_v57 = vld [vmem:[%s1297_s3 + $0x68] sm:$0xff] }
  0x14   : > { %353 = vmatpush.bf16.msra.mxu0 %v1060_v8  ;;  %400 = vmatpush.bf16.msra.mxu1 %v1062_v9  ;;  %v256_v58 = vld [vmem:[%s1297_s3 + $0x78] sm:$0xff]  ;;  %v1090_v5 = vld [vmem:[%s206_s6] ss:$0 sm:$0xff] }
  0x15   : > { %259 = vperm.xlu0 %1087, %v241_v6   ;;  %264 = vperm.xlu1 %1088, %v242_v7   ;;  %vm679_vm3 = vcmp.ne.s32.totalorder %v1090_v5, 0 }
  0x16   : > { %1075 = vmatpush.bf16.msra.mxu2 %v1062_v9 }
  0x17   : > { %1001 = vmatmul.msk.bf16.vlgmr.msra.gmra.mxu0 %vm339_vm0, %v1066_v10  ;;  %1019 = vmatmul.msk.bf16.vlgmr.msra.gmra.mxu1 %vm339_vm0, %v1068_v11 }
  0x19   : > { %1020 = vmatmul.msk.bf16.vlgmr.msra.gmra.mxu2 %vm339_vm0, %v1069_v12 }
  0x1a   : > { %446 = vmatpush.bf16.msrb.mxu2 %v1065_v19 }
  0x1d   : > { %269 = vperm.xlu0 %1087, %v243_v13   ;;  %294 = vperm.xlu1 %1088, %v248_v14  }
  0x1e   : > { %447 = vmatpush.bf16.msrb.mxu2 %v1064_v23 }
  0x25   : > { %274 = vperm.xlu0 %1087, %v244_v15  }
  0x27   : > { %1002 = vmatmul.msk.bf16.gmra.mxu0 %vm339_vm0, %v1067_v16 }
  0x29   : > { %1037 = vmatmul.msk.bf16.vlgmr.msrb.gmra.mxu2 %vm339_vm0, %v1070_v27 }
  0x39   : > { %1038 = vmatmul.msk.bf16.gmra.mxu2 %vm339_vm0, %v1071_v45 }
  0x69   : > { %v290_v29 = vpop.permute.xlu2 %289 }
  0x7f   : > { %v280_v17 = vpop.permute.xlu0 %279  ;;  %v285_v18 = vpop.permute.xlu1 %284 }
  0x87   : > { %v260_v20 = vpop.permute.xlu0 %259  ;;  %v265_v28 = vpop.permute.xlu1 %264 }
  0x8f   : > { %v270_v39 = vpop.permute.xlu0 %269  ;;  %v295_v40 = vpop.permute.xlu1 %294 }
  0x94   : > { %v355_v21 = vpop.f32.mrf.mxu0  ;;  %v402_v22 = vpop.f32.mrf.mxu1 }
  0x95   : > { %v356_v24 = vadd.f32 %v355_v21, %v260_v20  ;;  %v403_v25 = vadd.f32 %v402_v22, %v280_v17 }
  0x97   : > { %v591_v26 = vpack.c.bf16 %v356_v24, %v356_v24  ;;  %459 = vxpose.xlu2.b32.start.end [1/1] (short) (narrow) %v403_v25, 8  ;;  %v275_v46 = vpop.permute.xlu0 %274 }
  0x99   : > { %v601_v30 = vsel %vm599_vm1, %v591_v26, 0 }
  0x9a   : > { %610 = vmatpush.bf16.msra.mxu3 %v601_v30 }
  0x9c   : > { %v407_v31 = vpop.f32.mrf.mxu2  ;;  %v357_v33 = vpop.f32.mrf.mxu0 }
  0x9d   : > { %v408_v32 = vadd.f32 %v407_v31, %v290_v29  ;;  %v404_v34 = vpop.f32.mrf.mxu1  ;;  %v358_v35 = vadd.f32 %v357_v33, %v265_v28 }
  0x9e   : > { %v405_v36 = vadd.f32 %v404_v34, %v285_v18 }
  0x9f   : > { %523 = vxpose.xlu0.b32.start.end [1/1] (short) (narrow) %v408_v32, 8  ;;  %v592_v37 = vpack.c.bf16 %v358_v35, %v358_v35 }
  0xa0   : > { %491 = vxpose.xlu1.b32.start.end [1/1] (short) (narrow) %v405_v36, 8 }
  0xa1   : > { %v620_v38 = vsel %vm599_vm1, %v592_v37, 0 }
  0xa2   : > { %629 = vmatpush.bf16.msrb.mxu3 %v620_v38 }
  0xa4   : > { %v409_v41 = vpop.f32.mrf.mxu2  ;;  %v360_v43 = vpop.f32.mrf.mxu0 }
  0xa5   : > { %v410_v42 = vadd.f32 %v409_v41, %v295_v40  ;;  %v361_v44 = vadd.f32 %v360_v43, %v270_v39 }
  0xa7   : > { %555 = vxpose.xlu2.b32.start.end [1/1] (short) (narrow) %v410_v42, 8  ;;  %v593_v59 = vpack.c.bf16 %v361_v44, %v361_v44 }
  0xa9   : > { %v639_v62 = vsel %vm599_vm1, %v593_v59, 0 }
  0xac   : > { %v362_v47 = vpop.f32.mrf.mxu0  ;;  %v449_v35 = vpop.f32.mrf.mxu2 }
  0xad   : > { %v363_v48 = vadd.f32 %v362_v47, %v275_v46 }
  0xaf   : > { %v594_v49 = vpack.c.bf16 %v363_v48, %v363_v48 }
  0xb1   : > { %v658_v50 = vsel %vm599_vm1, %v594_v49, 0 }
  0xb2   : > { %667 = vmatpush.bf16.msrb.mxu0 %v658_v50 }
  0xfa   : > { %314 = vperm.xlu1 %1088, %v252_v51  }
 0x102   : > { %856 = vperm.xlu1 %1088, %v253_v52   ;;  %v1254_v52 = vpop.f32.mrf.mxu2 }
 0x10a   : > { %866 = vperm.xlu1 %1088, %v255_v53  }
 0x10d   : > { %304 = vperm.xlu0 %1087, %v250_v54  }
 0x110   : > { %309 = vperm.xlu2 %1089, %v251_v55  }
 0x118   : > { %299 = vperm.xlu2 %1089, %v249_v56  }
 0x120   : > { %861 = vperm.xlu2 %1089, %v254_v57  }
 0x128   : > { %871 = vperm.xlu2 %1089, %v256_v58  }
 0x130   : > { %v475_v60 = vpop.trf.xlu2 }
 0x131   : > { %v587_v61 = vpack.c.bf16 %v475_v60, %v475_v60 }
 0x133   : > { %1039 = vmatmul.msk.bf16.vlgmr.msra.gmra.mxu3 %vm595_vm2, %v587_v61 }
 0x134   : > { %648 = vmatpush.bf16.msra.mxu3 %v639_v62 }
 0x140   : > { %v571_v63 = vpop.trf.xlu2 }
 0x141   : > { %v590_v0 = vpack.c.bf16 %v571_v63, %v571_v63 }
 0x143   : > { %1042 = vmatmul.msk.bf16.vlgmr.msrb.gmra.mxu0 %vm595_vm2, %v590_v0  ;;  %v539_v3 = vpop.trf.xlu0 }
 0x144   : > { %v507_v1 = vpop.trf.xlu1  ;;  %v589_v4 = vpack.c.bf16 %v539_v3, %v539_v3 }
 0x145   : > { %v588_v2 = vpack.c.bf16 %v507_v1, %v507_v1 }
 0x147   : > { %1040 = vmatmul.msk.bf16.vlgmr.msrb.gmra.mxu3 %vm595_vm2, %v588_v2 }
 0x157   : > { %1041 = vmatmul.msk.bf16.vlgmr.msra.gmra.mxu3 %vm595_vm2, %v589_v4 }
 0x16a   : > { %v1256_v53 = vpop.permute.xlu2 %309 }
 0x1b6   : > { %v612_v6 = vpop.f32.mrf.mxu3 }
 0x1b7   : > { %v673_v7 = vmul.f32 0.35355338, %v612_v6 }
 0x1b9   : > { %v680_v8 = vsel %vm679_vm3, %v673_v7, -1e+12 }
 0x1ba   : > { %v684_v9 = vsel %vm595_vm2, %v680_v8, -inf }
 0x1bb   : > { %v685_v10 = vrot.slane %v684_v9, 4 }
 0x1bd   : > { %v686_v11 = vmax.f32 %v684_v9, %v685_v10  ;;  %v300_v9 = vpop.permute.xlu2 %299 }
 0x1be   : > { %v614_v12 = vpop.f32.mrf.mxu3 }
 0x1bf   : > { %v687_v13 = vrot.slane %v686_v11, 2 }
 0x1c0   : > { %v669_v14 = vpop.f32.mrf.mxu0 }
 0x1c1   : > { %v676_v15 = vmul.f32 0.35355338, %v669_v14  ;;  %v688_v16 = vmax.f32 %v686_v11, %v687_v13 }
 0x1c3   : > { %v683_v17 = vsel %vm679_vm3, %v676_v15, -1e+12  ;;  %v689_v18 = vrot.slane %v688_v16, 1 }
 0x1c4   : > { %v705_v19 = vsel %vm595_vm2, %v683_v17, -inf }
 0x1c5   : > { %v706_v20 = vrot.slane %v705_v19, 4  ;;  %v690_v21 = vmax.f32 %v688_v16, %v689_v18 }
 0x1c7   : > { %v707_v22 = vmax.f32 %v705_v19, %v706_v20  ;;  %v712_v23 = vsub.f32 %v680_v8, %v690_v21  ;;  %v454_v8 = vpop.f32.mrf.mxu2 }
 0x1c8   : > { %v671_v24 = vpop.f32.mrf.mxu0 }
 0x1c9   : > { %v708_v25 = vrot.slane %v707_v22, 2  ;;  %v716_v26 = vmul.f32 1.442695, %v712_v23 }
 0x1ca   : > { %v631_v27 = vpop.f32.mrf.mxu3 }
 0x1cb   : > { %v709_v28 = vmax.f32 %v707_v22, %v708_v25  ;;  %v674_v29 = vmul.f32 0.35355338, %v631_v27  ;;  %1091 = vpow2.f32 %v716_v26 }
 0x1cd   : > { %v710_v30 = vrot.slane %v709_v28, 1  ;;  %v681_v31 = vsel %vm679_vm3, %v674_v29, -1e+12  ;;  %v315_v29 = vpop.permute.xlu1 %314 }
 0x1ce   : > { %v691_v32 = vsel %vm595_vm2, %v681_v31, -inf }
 0x1cf   : > { %v711_v33 = vmax.f32 %v709_v28, %v710_v30  ;;  %v692_v34 = vrot.slane %v691_v32, 4  ;;  %v456_v28 = vpop.f32.mrf.mxu2 }
 0x1d1   : > { %v715_v36 = vsub.f32 %v683_v17, %v711_v33  ;;  %v693_v37 = vmax.f32 %v691_v32, %v692_v34  ;;  %v1092_v38 = vpop.eup %1091  ;;  %v450_v17 = vadd.f32 %v449_v35, %v300_v9  ;;  %v457_v33 = vadd.f32 %v456_v28, %v315_v29 }
 0x1d2   : > { %v633_v39 = vpop.f32.mrf.mxu3  ;;  %v724_v40 = vsel %vm595_vm2, %v1092_v38, 0.0 }
 0x1d3   : > { %v722_v41 = vmul.f32 1.442695, %v715_v36  ;;  %v694_v42 = vrot.slane %v693_v37, 2  ;;  %v725_v43 = vrot.slane %v724_v40, 4  ;;  %v760_v24 = vpack.c.bf16 %v450_v17, %v450_v17 }
 0x1d5   : > { %1093 = vpow2.f32 %v722_v41  ;;  %v695_v44 = vmax.f32 %v693_v37, %v694_v42  ;;  %v726_v45 = vadd.f32 %v725_v43, %v724_v40  ;;  %v763_v37 = vpack.c.bf16 %v457_v33, %v457_v33  ;;  %v305_v41 = vpop.permute.xlu0 %304 }
 0x1d7   : > { %v696_v46 = vrot.slane %v695_v44, 1  ;;  %v727_v47 = vrot.slane %v726_v45, 2 }
 0x1d9   : > { %v697_v48 = vmax.f32 %v695_v44, %v696_v46  ;;  %v728_v50 = vadd.f32 %v727_v47, %v726_v45  ;;  %v452_v45 = vadd.f32 %v1254_v52, %v305_v41 }
 0x1da   : > { %v650_v49 = vpop.f32.mrf.mxu3 }
 0x1db   : > { %v1094_v51 = vpop.eup %1093  ;;  %v713_v54 = vsub.f32 %v681_v31, %v697_v48  ;;  %v675_v55 = vmul.f32 0.35355338, %v650_v49  ;;  %v729_v57 = vrot.slane %v728_v50, 1 }
 0x1dc   : > { %v745_v56 = vsel %vm595_vm2, %v1094_v51, 0.0 }
 0x1dd   : > { %v746_v58 = vrot.slane %v745_v56, 4  ;;  %v718_v59 = vmul.f32 1.442695, %v713_v54  ;;  %v682_v60 = vsel %vm679_vm3, %v675_v55, -1e+12  ;;  %v730_v62 = vadd.f32 %v729_v57, %v728_v50 }
 0x1de   : > { %v698_v61 = vsel %vm595_vm2, %v682_v60, -inf  ;;  %v761_v50 = vpack.c.bf16 %v452_v45, %v452_v45 }
 0x1df   : > { %v747_v63 = vadd.f32 %v746_v58, %v745_v56  ;;  %1095 = vpow2.f32 %v718_v59  ;;  %v699_v0 = vrot.slane %v698_v61, 4  ;;  %v455_v56 = vadd.f32 %v454_v8, %v1256_v53 }
 0x1e0   : > { %1097 = vrcp.f32 %v730_v62 }
 0x1e1   : > { %v748_v1 = vrot.slane %v747_v63, 2  ;;  %v700_v2 = vmax.f32 %v698_v61, %v699_v0  ;;  %v762_v58 = vpack.c.bf16 %v455_v56, %v455_v56 }
 0x1e2   : > { %v652_v3 = vpop.f32.mrf.mxu3 }
 0x1e3   : > { %v749_v4 = vadd.f32 %v748_v1, %v747_v63  ;;  %v701_v6 = vrot.slane %v700_v2, 2  ;;  %v216_v1 = vld [vmem:[%s1164_s26 + $0x8] sm:$0xff]  }
 0x1e4   : > { %v846_v3 = vunpack.c.l.bf16 %v216_v1 }
 0x1e5   : > { %v1096_v7 = vpop.eup %1095  ;;  %v702_v10 = vmax.f32 %v700_v2, %v701_v6  ;;  %v750_v11 = vrot.slane %v749_v4, 1  ;;  %v847_v2 = vunpack.c.h.bf16 %v216_v1 }
 0x1e6   : > { %v1098_v12 = vpop.eup %1097  ;;  %v731_v5 = vsel %vm595_vm2, %v1096_v7, 0.0 }
 0x1e7   : > { %v732_v13 = vrot.slane %v731_v5, 4  ;;  %v703_v14 = vrot.slane %v702_v10, 1  ;;  %v756_v15 = vmul.f32 %v1098_v12, %v1092_v38  ;;  %v751_v16 = vadd.f32 %v750_v11, %v749_v4  ;;  %v213_v4 = vld [vmem:[%s1164_s26] sm:$0xff]  }
 0x1e8   : > { %v845_v6 = vunpack.c.h.bf16 %v213_v4 }
 0x1e9   : > { %v733_v18 = vadd.f32 %v732_v13, %v731_v5  ;;  %v704_v19 = vmax.f32 %v702_v10, %v703_v14  ;;  %v764_v20 = vpack.c.bf16 %v756_v15, %v756_v15  ;;  %1099 = vrcp.f32 %v751_v16  ;;  %v1072_v14 = vld [vmem:[%s1296_s2 + $0x30] sm:$0xff]  ;;  %v1073_v15 = vld [vmem:[%s1296_s2 + $0x38] sm:$0xff]  ;;  %v857_v16 = vpop.permute.xlu1 %856 }
 0x1eb   : > { %v734_v21 = vrot.slane %v733_v18, 2  ;;  %v714_v22 = vsub.f32 %v682_v60, %v704_v19  ;;  %v772_v23 = vsel %vm599_vm1, %v764_v20, 0  ;;  %v862_v19 = vpop.permute.xlu2 %861 }
 0x1ec   : > { %781 = vmatpush.bf16.msrb.mxu1 %v772_v23 }
 0x1ed   : > { %v735_v25 = vadd.f32 %v734_v21, %v733_v18  ;;  %v720_v26 = vmul.f32 1.442695, %v714_v22 }
 0x1ef   : > { %v1100_v27 = vpop.eup %1099  ;;  %1101 = vpow2.f32 %v720_v26  ;;  %1043 = vmatmul.msk.bf16.vlgmr.msrb.gmra.mxu1 %vm595_vm2, %v760_v24  ;;  %v736_v30 = vrot.slane %v735_v25, 1 }
 0x1f0   : > { %v759_v31 = vmul.f32 %v1100_v27, %v1094_v51 }
 0x1f1   : > { %v737_v32 = vadd.f32 %v736_v30, %v735_v25  ;;  %v867_v22 = vpop.permute.xlu1 %866 }
 0x1f2   : > { %v767_v34 = vpack.c.bf16 %v759_v31, %v759_v31 }
 0x1f3   : > { %1103 = vrcp.f32 %v737_v32  ;;  %v872_v25 = vpop.permute.xlu2 %871 }
 0x1f4   : > { %v829_v35 = vsel %vm599_vm1, %v767_v34, 0 }
 0x1f5   : > { %v1102_v36 = vpop.eup %1101  ;;  %838 = vmatpush.bf16.msra.mxu0 %v829_v35 }
 0x1f6   : > { %v738_v38 = vsel %vm595_vm2, %v1102_v36, 0.0 }
 0x1f7   : > { %v739_v39 = vrot.slane %v738_v38, 4 }
 0x1f8   : > { %1046 = vmatmul.msk.bf16.vlgmr.msra.gmra.mxu0 %vm595_vm2, %v763_v37 }
 0x1f9   : > { %v1104_v40 = vpop.eup %1103  ;;  %v740_v42 = vadd.f32 %v739_v39, %v738_v38 }
 0x1fa   : > { %v757_v43 = vmul.f32 %v1104_v40, %v1096_v7  ;;  %v844_v7 = vunpack.c.l.bf16 %v213_v4 }
 0x1fb   : > { %v741_v44 = vrot.slane %v740_v42, 2 }
 0x1fc   : > { %v765_v46 = vpack.c.bf16 %v757_v43, %v757_v43 }
 0x1fd   : > { %v742_v47 = vadd.f32 %v741_v44, %v740_v42 }
 0x1fe   : > { %v791_v48 = vsel %vm599_vm1, %v765_v46, 0 }
 0x1ff   : > { %800 = vmatpush.bf16.msra.mxu2 %v791_v48  ;;  %v743_v49 = vrot.slane %v742_v47, 1 }
 0x201   : > { %v744_v51 = vadd.f32 %v743_v49, %v742_v47 }
 0x202   : > { %1044 = vmatmul.msk.bf16.vlgmr.msra.gmra.mxu2 %vm595_vm2, %v761_v50 }
 0x203   : > { %1105 = vrcp.f32 %v744_v51 }
 0x209   : > { %v1106_v54 = vpop.eup %1105 }
 0x20a   : > { %v758_v55 = vmul.f32 %v1106_v54, %v1102_v36 }
 0x20c   : > { %v766_v57 = vpack.c.bf16 %v758_v55, %v758_v55 }
 0x20e   : > { %v810_v52 = vsel %vm599_vm1, %v766_v57, 0 }
 0x20f   : > { %819 = vmatpush.bf16.msrb.mxu3 %v810_v52 }
 0x212   : > { %1045 = vmatmul.msk.bf16.vlgmr.msrb.gmra.mxu3 %vm595_vm2, %v762_v58 }
 0x26c   : > { %v783_v59 = vpop.f32.mrf.mxu1 }
 0x26d   : > { %v848_v12 = vadd.f32 %v844_v7, %v783_v59 }
 0x274   : > { %v785_v60 = vpop.f32.mrf.mxu1 }
 0x275   : > { %v840_v61 = vpop.f32.mrf.mxu0 }
 0x276   : > { %v851_v8 = vadd.f32 %v847_v2, %v840_v61 }
 0x27d   : > { %v842_v62 = vpop.f32.mrf.mxu0 }
 0x285   : > { %v802_v63 = vpop.f32.mrf.mxu2 }
 0x286   : > { %v849_v10 = vadd.f32 %v845_v6, %v802_v63 }
 0x288   : > { %v852_v5 = vpack.c.bf16 %v849_v10, %v848_v12 }
 0x28d   : > { %v804_v0 = vpop.f32.mrf.mxu2 }
 0x295   : > { %v821_v53 = vpop.f32.mrf.mxu3 }
 0x296   : > { %v850_v9 = vadd.f32 %v846_v3, %v821_v53 }
 0x298   : > { %v853_v11 = vpack.c.bf16 %v851_v8, %v850_v9 }
 0x29a   : > { %896 = vmatpush.bf16.msra.mxu1 %v853_v11 }
 0x29d   : > { %v823_v13 = vpop.f32.mrf.mxu3 }
 0x29e   : > { %897 = vmatpush.bf16.msra.mxu1 %v852_v5 }
 0x2a1   : > { %1055 = vmatmul.msk.bf16.vlgmr.msra.gmra.mxu1 %vm339_vm0, %v1072_v14 }
 0x2b1   : > { %1056 = vmatmul.msk.bf16.gmra.mxu1 %vm339_vm0, %v1073_v15 }
 0x31e   : > { %v899_v17 = vpop.f32.mrf.mxu1 }
 0x31f   : > { %v900_v18 = vadd.f32 %v899_v17, %v857_v16 }
 0x321   : > { %909 = vst.msk [vmem:[%s211_s28] sm:$0xff] %vm595_vm2, %v900_v18 }
 0x326   : > { %v901_v20 = vpop.f32.mrf.mxu1 }
 0x327   : > { %v902_v21 = vadd.f32 %v901_v20, %v862_v19 }
 0x329   : > { %910 = vst.msk [vmem:[%s211_s28 + $0x8] sm:$0xff] %vm595_vm2, %v902_v21 }
 0x32e   : > { %v904_v23 = vpop.f32.mrf.mxu1 }
 0x32f   : > { %v905_v24 = vadd.f32 %v904_v23, %v867_v22 }
 0x331   : > { %911 = vst.msk [vmem:[%s211_s28 + $0x10] sm:$0xff] %vm595_vm2, %v905_v24 }
 0x336   : > { %v906_v26 = vpop.f32.mrf.mxu1 }
 0x337   : > { %v907_v27 = vadd.f32 %v906_v26, %v872_v25 }
 0x339   : > { %912 = vst.msk [vmem:[%s211_s28 + $0x18] sm:$0xff] %vm595_vm2, %v907_v27 }
 0x33a PF: > { %s14_s15 = sadd.s32 1, %s1113_s15  }
 0x33b   : > { %p11_p4 = scmp.ge.s32.totalorder %s14_s15, 4  }
 0x33d   :  { %13 = sbr.rel (!%p11_p4) target bundleno = 1 (0x1), region = 69 }

</bundles_post_ra>
